<compile_context>
chip_gen: v5e
topology: v5e:2x2
jax: 0.10.0
libtpu: 0.0.40
codegen_flags: <defaults>
</compile_context>

<pallas_src>
import functools

import jax
import jax.numpy as jnp
from jax.experimental import pallas as pl
from jax.experimental.pallas import tpu as pltpu

_HIGHEST = jax.lax.Precision.HIGHEST


def _round_up(a: int, b: int) -> int:
    return (a + b - 1) // b * b


def linkx_kernel(a_ref, wa_hi_ref, wa_lo_ref, seed_ref, logp_ref, h_ref, acc_ref):
    k = pl.program_id(1)

    # First K step: seed the accumulator with the precomputed feature branch
    # (x @ wx + fused bias; padded class columns already at -1e30).
    @pl.when(k == 0)
    def _():
        acc_ref[...] = seed_ref[...]

    # Adjacency branch: native bf16 MXU with f32 accumulation.  The hi/lo
    # split of the folded weight recovers ~f32 accuracy in two bf16 passes.
    a = a_ref[...]
    acc_ref[...] += (
        jnp.dot(a, wa_hi_ref[...], preferred_element_type=jnp.float32)
        + jnp.dot(a, wa_lo_ref[...], preferred_element_type=jnp.float32))

    # Last K step: finalize logits and log_softmax over lane-padded classes.
    @pl.when(k == pl.num_programs(1) - 1)
    def _():
        logits = acc_ref[...]
        h_ref[...] = logits
        m = jnp.max(logits, axis=-1, keepdims=True)
        s = logits - m
        lse = jnp.log(jnp.sum(jnp.exp(s), axis=-1, keepdims=True))
        logp_ref[...] = s - lse


@functools.partial(jax.jit, static_argnames=("row_tile", "k_tile"))
def linkx_forward(x, edge_index, w1, b1, w2, b2, w_out, b_out,
                  *, row_tile=512, k_tile=2048):
    """x: [N, F]; edge_index: [2, E]; weights pre-transposed to [in, out]."""
    N, F = x.shape
    H = w1.shape[1]
    C = w_out.shape[1]

    # Fold the purely-linear chain outside the kernel (tiny matmuls, true f32).
    wo_top, wo_bot = w_out[:H, :], w_out[H:, :]
    wa = jnp.dot(w1, wo_top, precision=_HIGHEST)                   # [N, C]
    wx = jnp.dot(w2, wo_bot, precision=_HIGHEST)                   # [F, C]
    bias = (jnp.dot(b1, wo_top, precision=_HIGHEST)
            + jnp.dot(b2, wo_bot, precision=_HIGHEST) + b_out)     # [C]

    # Lane / tile padding (clamp tiles for small graphs).
    c_pad = _round_up(C, 128)
    row_tile = min(row_tile, _round_up(N, 128))
    k_tile = min(k_tile, _round_up(N, 128))
    n_rows = _round_up(N, row_tile)
    n_cols = _round_up(N, k_tile)

    # Dense COO adjacency (duplicate edges accumulate), built directly at its
    # padded shape in bf16 by a single scatter-add — no f32 densify + pad/cast
    # pre-pass in front of the kernel.  Exact for integer edge counts <= 256.
    adj_p = jnp.zeros((n_rows, n_cols), jnp.bfloat16).at[
        edge_index[0], edge_index[1]].add(
            jnp.ones((edge_index.shape[1],), jnp.bfloat16))

    # bf16 hi/lo split of the folded adjacency weight: native bf16 MXU passes,
    # ~f32 accuracy, and half the f32 re-fetch traffic per row-tile sweep.
    wa_hi = wa.astype(jnp.bfloat16)
    wa_lo = (wa - wa_hi.astype(jnp.float32)).astype(jnp.bfloat16)
    wa_hi_p = jnp.zeros((n_cols, c_pad), jnp.bfloat16).at[:N, :C].set(wa_hi)
    wa_lo_p = jnp.zeros((n_cols, c_pad), jnp.bfloat16).at[:N, :C].set(wa_lo)

    # Feature branch + fused bias precomputed into the accumulator seed.
    # Padded class columns -> -1e30 (exact zeros under softmax); padded rows
    # get 0 in real columns (finite; sliced away below).
    neg = jnp.float32(-1e30)
    feat = jnp.dot(x, wx, precision=_HIGHEST) + bias
    seed_real = jnp.zeros((n_rows, C), jnp.float32).at[:N].set(feat)
    seed_p = jnp.full((n_rows, c_pad), neg, jnp.float32).at[:, :C].set(seed_real)

    rows = lambda i, k: (i, 0)
    grid_spec = pltpu.PrefetchScalarGridSpec(
        num_scalar_prefetch=0,
        grid=(n_rows // row_tile, n_cols // k_tile),
        in_specs=[
            # Adjacency slab (bf16).  If xprof shows exposed DMA, add
            # pipeline_mode=pl.Buffered(3) here for deeper prefetch.
            pl.BlockSpec((row_tile, k_tile), lambda i, k: (i, k)),
            pl.BlockSpec((k_tile, c_pad), lambda i, k: (k, 0)),   # wa_hi (bf16)
            pl.BlockSpec((k_tile, c_pad), lambda i, k: (k, 0)),   # wa_lo (bf16)
            pl.BlockSpec((row_tile, c_pad), rows),                # feature seed
        ],
        out_specs=[
            pl.BlockSpec((row_tile, c_pad), rows),   # log-probs
            pl.BlockSpec((row_tile, c_pad), rows),   # raw logits h
        ],
        scratch_shapes=[pltpu.VMEM((row_tile, c_pad), jnp.float32)],
    )

    out_shapes = (
        jax.ShapeDtypeStruct((n_rows, c_pad), jnp.float32),
        jax.ShapeDtypeStruct((n_rows, c_pad), jnp.float32),
    )

    # VMEM budget: double-buffered pipelined blocks + scratch, with headroom,
    # clamped to stay comfortably under v7x's 64 MiB physical VMEM.  (On
    # v5e/v6e, row_tile=1024 / k_tile=4096 with a ~96 MiB limit is also valid.)
    vmem_bytes = (
        2 * row_tile * k_tile * 2            # adjacency blocks (bf16)
        + 2 * 2 * k_tile * c_pad * 2         # wa hi/lo blocks (bf16)
        + 2 * row_tile * c_pad * 4           # feature-seed blocks
        + 2 * 2 * row_tile * c_pad * 4       # two outputs
        + row_tile * c_pad * 4)              # accumulator scratch
    vmem_limit = min(max(32 * 1024 * 1024, 2 * vmem_bytes), 48 * 1024 * 1024)

    logp_p, h_p = pl.pallas_call(
        linkx_kernel,
        out_shape=out_shapes,
        grid_spec=grid_spec,
        compiler_params=pltpu.CompilerParams(
            dimension_semantics=("parallel", "arbitrary"),
            vmem_limit_bytes=vmem_limit),
    )(adj_p, wa_hi_p, wa_lo_p, seed_p)

    return logp_p[:N, :C], h_p[:N, :C]


def reference_forward(x, edge_index, w1, b1, w2, b2, w_out, b_out):
    N = x.shape[0]
    adj = jnp.zeros((N, N), jnp.float32).at[
        edge_index[0], edge_index[1]].add(1.0)
    h1 = jnp.dot(adj, w1, precision=_HIGHEST) + b1
    h2 = jnp.dot(x, w2, precision=_HIGHEST) + b2
    h = jnp.dot(jnp.concatenate([h1, h2], axis=1), w_out,
                precision=_HIGHEST) + b_out
    return jax.nn.log_softmax(h, axis=1), h


if __name__ == "__main__":
    def make_problem(key, N, F, H, C, E):
        k_x, k_e, k_w1, k_b1, k_w2, k_b2, k_wo, k_bo = jax.random.split(key, 8)
        x = jax.random.normal(k_x, (N, F), dtype=jnp.float32)
        edge_index = jax.random.randint(k_e, (2, E), 0, N)

        # PyTorch Linear init, kept in transposed [in, out] layout.
        def linear_params(kw, kb, fan_in, fan_out):
            bound = 1.0 / jnp.sqrt(fan_in)
            w = jax.random.uniform(kw, (fan_in, fan_out), jnp.float32, -bound, bound)
            b = jax.random.uniform(kb, (fan_out,), jnp.float32, -bound, bound)
            return w, b

        w1, b1 = linear_params(k_w1, k_b1, N, H)            # self.w11
        w2, b2 = linear_params(k_w2, k_b2, F, H)            # self.w22
        w_out, b_out = linear_params(k_wo, k_bo, 2 * H, C)  # self.out
        return x, edge_index, w1, b1, w2, b2, w_out, b_out

    key = jax.random.PRNGKey(0)
    k_small, k_big = jax.random.split(key)

    # Small, LINKX-consistent shapes.
    args_small = make_problem(k_small, N=16, F=8, H=32, C=8, E=40)
    logp, h = linkx_forward(*args_small)
    jax.block_until_ready((logp, h))
    logp_ref, h_ref = reference_forward(*args_small)
    assert jnp.allclose(h, h_ref, atol=1e-4, rtol=1e-4)
    assert jnp.allclose(logp, logp_ref, atol=1e-4, rtol=1e-4)

    # Ragged, multi-tile problem: exercises row/K grid, accumulator, padding.
    args_big = make_problem(k_big, N=300, F=24, H=48, C=7, E=1200)
    logp2, h2 = linkx_forward(*args_big, row_tile=128, k_tile=128)
    jax.block_until_ready((logp2, h2))
    logp2_ref, h2_ref = reference_forward(*args_big)
    assert jnp.allclose(h2, h2_ref, atol=1e-4, rtol=1e-4)
    assert jnp.allclose(logp2, logp2_ref, atol=1e-4, rtol=1e-4)

    print("KERNEL_OK")
</pallas_src>

<mosaic_0001>
module attributes {stable_mosaic.version = 11 : i64} {
  func.func @linkx_kernel(%arg0: i32, %arg1: i32, %arg2: memref<128x128xbf16, #tpu.memory_space<vmem>>, %arg3: memref<128x128xbf16, #tpu.memory_space<vmem>>, %arg4: memref<128x128xbf16, #tpu.memory_space<vmem>>, %arg5: memref<128x128xf32, #tpu.memory_space<vmem>>, %arg6: memref<128x128xf32, #tpu.memory_space<vmem>>, %arg7: memref<128x128xf32, #tpu.memory_space<vmem>>, %arg8: memref<128x128xf32, #tpu.memory_space<vmem>>) attributes {dimension_semantics = [#tpu.dimension_semantics<parallel>, #tpu.dimension_semantics<arbitrary>], iteration_bounds = array<i64: 1, 1>, scalar_prefetch = 0 : i64, scratch_operands = 1 : i64, tpu.core_type = #tpu.core_type<tc>, window_params = [{transform_indices = @transform_0, window_bounds = array<i64: 128, 128>}, {transform_indices = @transform_1, window_bounds = array<i64: 128, 128>}, {transform_indices = @transform_2, window_bounds = array<i64: 128, 128>}, {transform_indices = @transform_3, window_bounds = array<i64: 128, 128>}, {transform_indices = @transform_4, window_bounds = array<i64: 128, 128>}, {transform_indices = @transform_5, window_bounds = array<i64: 128, 128>}]} {
    %c0_i32 = arith.constant 0 : i32
    %0 = arith.cmpi eq, %arg1, %c0_i32 : i32
    %1 = arith.extui %0 : i1 to i32
    %c0_i32_0 = arith.constant 0 : i32
    %2 = arith.cmpi ne, %1, %c0_i32_0 : i32
    scf.if %2 {
      %c0_13 = arith.constant 0 : index
      %c0_14 = arith.constant 0 : index
      %15 = vector.load %arg5[%c0_13, %c0_14] : memref<128x128xf32, #tpu.memory_space<vmem>>, vector<128x128xf32>
      %c0_15 = arith.constant 0 : index
      %c0_16 = arith.constant 0 : index
      %16 = vector.load %arg8[%c0_15, %c0_16] : memref<128x128xf32, #tpu.memory_space<vmem>>, vector<128x128xf32>
      tpu.vector_store %arg8[%c0_15, %c0_16], %15 {strides = array<i32>} : memref<128x128xf32, #tpu.memory_space<vmem>>, vector<128x128xf32>,
    } else {
    }
    %c0 = arith.constant 0 : index
    %c0_1 = arith.constant 0 : index
    %3 = vector.load %arg2[%c0, %c0_1] : memref<128x128xbf16, #tpu.memory_space<vmem>>, vector<128x128xbf16>
    %c0_2 = arith.constant 0 : index
    %c0_3 = arith.constant 0 : index
    %4 = vector.load %arg8[%c0_2, %c0_3] : memref<128x128xf32, #tpu.memory_space<vmem>>, vector<128x128xf32>
    %c0_4 = arith.constant 0 : index
    %c0_5 = arith.constant 0 : index
    %5 = vector.load %arg3[%c0_4, %c0_5] : memref<128x128xbf16, #tpu.memory_space<vmem>>, vector<128x128xbf16>
    %cst = arith.constant dense<0.000000e+00> : vector<128x128xf32>
    %6 = tpu.matmul %3, %5, %cst {dimension_numbers = #tpu.dot_dimension_numbers<[1], [0], [0], [1], [0, 0, 1, 1], [], []>} : vector<128x128xbf16>, vector<128x128xbf16>, vector<128x128xf32> -> vector<128x128xf32>
    %c0_6 = arith.constant 0 : index
    %c0_7 = arith.constant 0 : index
    %7 = vector.load %arg4[%c0_6, %c0_7] : memref<128x128xbf16, #tpu.memory_space<vmem>>, vector<128x128xbf16>
    %cst_8 = arith.constant dense<0.000000e+00> : vector<128x128xf32>
    %8 = tpu.matmul %3, %7, %cst_8 {dimension_numbers = #tpu.dot_dimension_numbers<[1], [0], [0], [1], [0, 0, 1, 1], [], []>} : vector<128x128xbf16>, vector<128x128xbf16>, vector<128x128xf32> -> vector<128x128xf32>
    %9 = arith.addf %6, %8 : vector<128x128xf32>
    %10 = arith.addf %4, %9 : vector<128x128xf32>
    %c0_9 = arith.constant 0 : index
    %c0_10 = arith.constant 0 : index
    %11 = vector.load %arg8[%c0_9, %c0_10] : memref<128x128xf32, #tpu.memory_space<vmem>>, vector<128x128xf32>
    tpu.vector_store %arg8[%c0_9, %c0_10], %10 {strides = array<i32>} : memref<128x128xf32, #tpu.memory_space<vmem>>, vector<128x128xf32>,
    %c0_i32_11 = arith.constant 0 : i32
    %12 = arith.cmpi eq, %arg1, %c0_i32_11 : i32
    %13 = arith.extui %12 : i1 to i32
    %c0_i32_12 = arith.constant 0 : i32
    %14 = arith.cmpi ne, %13, %c0_i32_12 : i32
    scf.if %14 {
      %c0_13 = arith.constant 0 : index
      %c0_14 = arith.constant 0 : index
      %15 = vector.load %arg8[%c0_13, %c0_14] : memref<128x128xf32, #tpu.memory_space<vmem>>, vector<128x128xf32>
      %c0_15 = arith.constant 0 : index
      %c0_16 = arith.constant 0 : index
      %16 = vector.load %arg7[%c0_15, %c0_16] : memref<128x128xf32, #tpu.memory_space<vmem>>, vector<128x128xf32>
      tpu.vector_store %arg7[%c0_15, %c0_16], %15 {strides = array<i32>} : memref<128x128xf32, #tpu.memory_space<vmem>>, vector<128x128xf32>,
      %cst_17 = arith.constant dense<0xFF800000> : vector<128xf32>
      %17 = vector.multi_reduction <maximumf>, %15, %cst_17 [1] : vector<128x128xf32> to vector<128xf32>
      %18 = vector.shape_cast %17 : vector<128xf32> to vector<128x1xf32>
      %19 = vector.broadcast %18 : vector<128x1xf32> to vector<128x128xf32>
      %20 = arith.subf %15, %19 : vector<128x128xf32>
      %21 = math.exp %20 : vector<128x128xf32>
      %cst_18 = arith.constant dense<0.000000e+00> : vector<128xf32>
      %22 = vector.multi_reduction <add>, %21, %cst_18 [1] : vector<128x128xf32> to vector<128xf32>
      %23 = vector.shape_cast %22 : vector<128xf32> to vector<128x1xf32>
      %24 = math.log %23 : vector<128x1xf32>
      %25 = vector.broadcast %24 : vector<128x1xf32> to vector<128x128xf32>
      %26 = arith.subf %20, %25 : vector<128x128xf32>
      %c0_19 = arith.constant 0 : index
      %c0_20 = arith.constant 0 : index
      %27 = vector.load %arg6[%c0_19, %c0_20] : memref<128x128xf32, #tpu.memory_space<vmem>>, vector<128x128xf32>
      tpu.vector_store %arg6[%c0_19, %c0_20], %26 {strides = array<i32>} : memref<128x128xf32, #tpu.memory_space<vmem>>, vector<128x128xf32>,
    } else {
    }
    return
  }
  func.func @transform_0(%arg0: i32, %arg1: i32) -> (i32, i32) {
    %c0_i32 = arith.constant 0 : i32
    return %arg0, %arg1 : i32, i32
  }
  func.func @transform_1(%arg0: i32, %arg1: i32) -> (i32, i32) {
    %c0_i32 = arith.constant 0 : i32
    %c0_i32_0 = arith.constant 0 : i32
    return %arg1, %c0_i32 : i32, i32
  }
  func.func @transform_2(%arg0: i32, %arg1: i32) -> (i32, i32) {
    %c0_i32 = arith.constant 0 : i32
    %c0_i32_0 = arith.constant 0 : i32
    return %arg1, %c0_i32 : i32, i32
  }
  func.func @transform_3(%arg0: i32, %arg1: i32) -> (i32, i32) {
    %c0_i32 = arith.constant 0 : i32
    %c0_i32_0 = arith.constant 0 : i32
    return %arg0, %c0_i32 : i32, i32
  }
  func.func @transform_4(%arg0: i32, %arg1: i32) -> (i32, i32) {
    %c0_i32 = arith.constant 0 : i32
    %c0_i32_0 = arith.constant 0 : i32
    return %arg0, %c0_i32 : i32, i32
  }
  func.func @transform_5(%arg0: i32, %arg1: i32) -> (i32, i32) {
    %c0_i32 = arith.constant 0 : i32
    %c0_i32_0 = arith.constant 0 : i32
    return %arg0, %c0_i32 : i32, i32
  }
}

</mosaic_0001>

<bundles_post_ra>
// kernel: linkx_forward.1
= control target key start
LH: loop header
LB: loop body
LE: loop exit
PB: predicated region body
PF: predicated region fallthrough
CT: control target
= control target key end

     0   :  { %s1202_s2 = inlined_call_operand.vmem [shape: bf16[128,128], index: 2, kind: input, shape index: {}]   ;;  %s1203_s1 = inlined_call_operand.vmem [shape: bf16[128,128], index: 1, kind: input, shape index: {}]   ;;  %s1204_s0 = inlined_call_operand.vmem [shape: bf16[128,128], index: 0, kind: input, shape index: {}]   ;;  %s1205_s3 = inlined_call_operand.vmem [shape: f32[128,128], index: 3, kind: input, shape index: {}]   ;;  %s1206_s5 = inlined_call_operand.vmem [shape: f32[128,128], index: 5, kind: output, shape index: {1}]   ;;  %s1207_s4 = inlined_call_operand.vmem [shape: f32[128,128], index: 4, kind: output, shape index: {0}]  }
   0x1   :  { %v731_v0 = vld [vmem:[%s1202_s2 + $0x38] sm:$0xff]  ;;  %v730_v2 = vld [vmem:[%s1202_s2 + $0x30] sm:$0xff]  ;;  %v729_v4 = vld [vmem:[%s1202_s2 + $0x28] sm:$0xff] }
   0x2   :  { %v723_v1 = vld [vmem:[%s1203_s1 + $0x38] sm:$0xff]  ;;  %215 = vmatpush.bf16.msra.mxu0 %v731_v0  ;;  %732 = vmatpush.bf16.msra.mxu2 %v731_v0  ;;  %v722_v3 = vld [vmem:[%s1203_s1 + $0x30] sm:$0xff]  ;;  %v721_v5 = vld [vmem:[%s1203_s1 + $0x28] sm:$0xff] }
   0x3   :  { %312 = vmatpush.bf16.msra.mxu1 %v723_v1  ;;  %740 = vmatpush.bf16.msra.mxu3 %v723_v1  ;;  %v728_v6 = vld [vmem:[%s1202_s2 + $0x20] sm:$0xff]  ;;  %v727_v8 = vld [vmem:[%s1202_s2 + $0x18] sm:$0xff]  ;;  %v726_v10 = vld [vmem:[%s1202_s2 + $0x10] sm:$0xff] }
   0x4   :  { %v720_v7 = vld [vmem:[%s1203_s1 + $0x20] sm:$0xff]  ;;  %v719_v9 = vld [vmem:[%s1203_s1 + $0x18] sm:$0xff]  ;;  %v718_v11 = vld [vmem:[%s1203_s1 + $0x10] sm:$0xff] }
   0x5   :  { %v725_v12 = vld [vmem:[%s1202_s2 + $0x8] sm:$0xff]  ;;  %v724_v14 = vld [vmem:[%s1202_s2] sm:$0xff]  ;;  %v710_v20 = vld [vmem:[%s1204_s0 + $0x10] sm:$0xff] }
   0x6   :  { %216 = vmatpush.bf16.msra.mxu0 %v730_v2  ;;  %733 = vmatpush.bf16.msra.mxu2 %v730_v2  ;;  %v717_v13 = vld [vmem:[%s1203_s1 + $0x8] sm:$0xff]  ;;  %v716_v15 = vld [vmem:[%s1203_s1] sm:$0xff]  ;;  %v714_v21 = vld [vmem:[%s1204_s0 + $0x30] sm:$0xff] }
   0x7   :  { %313 = vmatpush.bf16.msra.mxu1 %v722_v3  ;;  %741 = vmatpush.bf16.msra.mxu3 %v722_v3  ;;  %v708_v16 = vld [vmem:[%s1204_s0] sm:$0xff]  ;;  %v709_v18 = vld [vmem:[%s1204_s0 + $0x8] sm:$0xff]  ;;  %v711_v22 = vld [vmem:[%s1204_s0 + $0x18] sm:$0xff] }
   0x8   :  { %v712_v17 = vld [vmem:[%s1204_s0 + $0x20] sm:$0xff]  ;;  %v713_v19 = vld [vmem:[%s1204_s0 + $0x28] sm:$0xff]  ;;  %v715_v23 = vld [vmem:[%s1204_s0 + $0x38] sm:$0xff] }
   0x9   :  { %v23_v25 = vld [vmem:[%s1205_s3] sm:$0xff]  ;;  %v24_v34 = vld [vmem:[%s1205_s3 + $0x8] sm:$0xff]  ;;  %v25_v44 = vld [vmem:[%s1205_s3 + $0x10] sm:$0xff] }
   0xa   :  { %217 = vmatpush.bf16.msra.mxu0 %v729_v4  ;;  %734 = vmatpush.bf16.msra.mxu2 %v729_v4  ;;  %v31_v30 = vld [vmem:[%s1205_s3 + $0x40] sm:$0xff]  ;;  %v32_v40 = vld [vmem:[%s1205_s3 + $0x48] sm:$0xff]  ;;  %v33_v50 = vld [vmem:[%s1205_s3 + $0x50] sm:$0xff] }
   0xb   :  { %314 = vmatpush.bf16.msra.mxu1 %v721_v5  ;;  %742 = vmatpush.bf16.msra.mxu3 %v721_v5  ;;  %v26_v54 = vld [vmem:[%s1205_s3 + $0x18] sm:$0xff]  ;;  %v27_v0 = vld [vmem:[%s1205_s3 + $0x20] sm:$0xff] }
   0xc   :  { %v34_v60 = vld [vmem:[%s1205_s3 + $0x58] sm:$0xff] }
   0xe   :  { %218 = vmatpush.bf16.msra.mxu0 %v728_v6  ;;  %735 = vmatpush.bf16.msra.mxu2 %v728_v6  ;;  %v35_v6 = vld [vmem:[%s1205_s3 + $0x60] sm:$0xff] }
   0xf   :  { %315 = vmatpush.bf16.msra.mxu1 %v720_v7  ;;  %743 = vmatpush.bf16.msra.mxu3 %v720_v7 }
  0x12   :  { %219 = vmatpush.bf16.msra.mxu0 %v727_v8  ;;  %736 = vmatpush.bf16.msra.mxu2 %v727_v8 }
  0x13   :  { %316 = vmatpush.bf16.msra.mxu1 %v719_v9  ;;  %744 = vmatpush.bf16.msra.mxu3 %v719_v9 }
  0x16   :  { %220 = vmatpush.bf16.msra.mxu0 %v726_v10  ;;  %737 = vmatpush.bf16.msra.mxu2 %v726_v10  ;;  %v28_v10 = vld [vmem:[%s1205_s3 + $0x28] sm:$0xff] }
  0x17   :  { %317 = vmatpush.bf16.msra.mxu1 %v718_v11  ;;  %745 = vmatpush.bf16.msra.mxu3 %v718_v11 }
  0x1a   :  { %221 = vmatpush.bf16.msra.mxu0 %v725_v12  ;;  %738 = vmatpush.bf16.msra.mxu2 %v725_v12 }
  0x1b   :  { %318 = vmatpush.bf16.msra.mxu1 %v717_v13  ;;  %746 = vmatpush.bf16.msra.mxu3 %v717_v13 }
  0x1e   :  { %222 = vmatpush.bf16.msra.mxu0 %v724_v14  ;;  %739 = vmatpush.bf16.msra.mxu2 %v724_v14 }
  0x1f   :  { %319 = vmatpush.bf16.msra.mxu1 %v716_v15  ;;  %747 = vmatpush.bf16.msra.mxu3 %v716_v15 }
  0x21   :  { %223 = vmatmul.bf16.vlgmr.msra.gmra.mxu0 %v708_v16  ;;  %243 = vmatmul.bf16.vlgmr.msra.gmra.mxu2 %v712_v17 }
  0x22   :  { %320 = vmatmul.bf16.vlgmr.msra.gmra.mxu1 %v708_v16  ;;  %340 = vmatmul.bf16.vlgmr.msra.gmra.mxu3 %v712_v17  ;;  %v36_v16 = vld [vmem:[%s1205_s3 + $0x68] sm:$0xff] }
  0x31   :  { %228 = vmatmul.bf16.gmra.mxu0 %v709_v18  ;;  %248 = vmatmul.bf16.gmra.mxu2 %v713_v19 }
  0x32   :  { %325 = vmatmul.bf16.gmra.mxu1 %v709_v18  ;;  %345 = vmatmul.bf16.gmra.mxu3 %v713_v19 }
  0x41   :  { %233 = vmatmul.bf16.gmra.mxu0 %v710_v20  ;;  %253 = vmatmul.bf16.gmra.mxu2 %v714_v21 }
  0x42   :  { %330 = vmatmul.bf16.gmra.mxu1 %v710_v20  ;;  %350 = vmatmul.bf16.gmra.mxu3 %v714_v21  ;;  %v29_v20 = vld [vmem:[%s1205_s3 + $0x30] sm:$0xff] }
  0x51   :  { %238 = vmatmul.bf16.gmra.mxu0 %v711_v22  ;;  %258 = vmatmul.bf16.gmra.mxu2 %v715_v23 }
  0x52   :  { %335 = vmatmul.bf16.gmra.mxu1 %v711_v22  ;;  %355 = vmatmul.bf16.gmra.mxu3 %v715_v23 }
  0x9e   :  { %v224_v24 = vpop.f32.mrf.mxu0 }
  0x9f   :  { %v321_v26 = vpop.f32.mrf.mxu1 }
  0xa0   :  { %v322_v27 = vadd.f32 %v321_v26, %v224_v24  ;;  %v37_v26 = vld [vmem:[%s1205_s3 + $0x70] sm:$0xff] }
  0xa2   :  { %v917_v28 = vadd.f32 %v322_v27, %v23_v25 }
  0xa4   :  { %412 = vst [vmem:[%s1206_s5] sm:$0xff] %v917_v28  ;;  %428 = vmax.xlane.f32.xlu0 %v917_v28  ;;  %v244_v29 = vpop.f32.mrf.mxu2 }
  0xa5   :  { %v341_v31 = vpop.f32.mrf.mxu3 }
  0xa6   :  { %v342_v32 = vadd.f32 %v341_v31, %v244_v29  ;;  %v226_v33 = vpop.f32.mrf.mxu0  ;;  %v30_v31 = vld [vmem:[%s1205_s3 + $0x38] sm:$0xff] }
  0xa7   :  { %v323_v35 = vpop.f32.mrf.mxu1 }
  0xa8   :  { %v930_v36 = vadd.f32 %v342_v32, %v31_v30  ;;  %v324_v37 = vadd.f32 %v323_v35, %v226_v33 }
  0xaa   :  { %420 = vst [vmem:[%s1206_s5 + $0x40] sm:$0xff] %v930_v36  ;;  %v936_v38 = vadd.f32 %v324_v37, %v24_v34  ;;  %444 = vmax.xlane.f32.xlu2 %v930_v36 }
  0xac   :  { %413 = vst [vmem:[%s1206_s5 + $0x8] sm:$0xff] %v936_v38  ;;  %430 = vmax.xlane.f32.xlu0 %v936_v38  ;;  %v246_v39 = vpop.f32.mrf.mxu2 }
  0xad   :  { %v343_v41 = vpop.f32.mrf.mxu3 }
  0xae   :  { %v344_v42 = vadd.f32 %v343_v41, %v246_v39  ;;  %v229_v43 = vpop.f32.mrf.mxu0  ;;  %v38_v39 = vld [vmem:[%s1205_s3 + $0x78] sm:$0xff] }
  0xaf   :  { %v326_v45 = vpop.f32.mrf.mxu1 }
  0xb0   :  { %v950_v46 = vadd.f32 %v344_v42, %v32_v40  ;;  %v327_v47 = vadd.f32 %v326_v45, %v229_v43 }
  0xb2   :  { %421 = vst [vmem:[%s1206_s5 + $0x48] sm:$0xff] %v950_v46  ;;  %v956_v48 = vadd.f32 %v327_v47, %v25_v44 }
  0xb4   :  { %414 = vst [vmem:[%s1206_s5 + $0x10] sm:$0xff] %v956_v48  ;;  %446 = vmax.xlane.f32.xlu0 %v950_v46  ;;  %432 = vmax.xlane.f32.xlu1 %v956_v48  ;;  %v249_v49 = vpop.f32.mrf.mxu2 }
  0xb5   :  { %v346_v51 = vpop.f32.mrf.mxu3 }
  0xb6   :  { %v347_v52 = vadd.f32 %v346_v51, %v249_v49  ;;  %v231_v53 = vpop.f32.mrf.mxu0 }
  0xb7   :  { %v328_v55 = vpop.f32.mrf.mxu1 }
  0xb8   :  { %v970_v56 = vadd.f32 %v347_v52, %v33_v50  ;;  %v329_v57 = vadd.f32 %v328_v55, %v231_v53 }
  0xba   :  { %422 = vst [vmem:[%s1206_s5 + $0x50] sm:$0xff] %v970_v56  ;;  %v976_v58 = vadd.f32 %v329_v57, %v26_v54 }
  0xbc   :  { %415 = vst [vmem:[%s1206_s5 + $0x18] sm:$0xff] %v976_v58  ;;  %448 = vmax.xlane.f32.xlu1 %v970_v56  ;;  %v251_v59 = vpop.f32.mrf.mxu2 }
  0xbd   :  { %v348_v61 = vpop.f32.mrf.mxu3 }
  0xbe   :  { %v349_v62 = vadd.f32 %v348_v61, %v251_v59  ;;  %v234_v63 = vpop.f32.mrf.mxu0 }
  0xbf   :  { %v331_v1 = vpop.f32.mrf.mxu1 }
  0xc0   :  { %v989_v2 = vadd.f32 %v349_v62, %v34_v60  ;;  %v332_v3 = vadd.f32 %v331_v1, %v234_v63 }
  0xc2   :  { %423 = vst [vmem:[%s1206_s5 + $0x58] sm:$0xff] %v989_v2  ;;  %v995_v4 = vadd.f32 %v332_v3, %v27_v0  ;;  %450 = vmax.xlane.f32.xlu2 %v989_v2 }
  0xc4   :  { %416 = vst [vmem:[%s1206_s5 + $0x20] sm:$0xff] %v995_v4  ;;  %434 = vmax.xlane.f32.xlu1 %v976_v58  ;;  %v254_v5 = vpop.f32.mrf.mxu2 }
  0xc5   :  { %v351_v7 = vpop.f32.mrf.mxu3 }
  0xc6   :  { %v352_v8 = vadd.f32 %v351_v7, %v254_v5  ;;  %v236_v9 = vpop.f32.mrf.mxu0 }
  0xc7   :  { %v333_v11 = vpop.f32.mrf.mxu1 }
  0xc8   :  { %v1009_v12 = vadd.f32 %v352_v8, %v35_v6  ;;  %v334_v13 = vadd.f32 %v333_v11, %v236_v9 }
  0xca   :  { %424 = vst [vmem:[%s1206_s5 + $0x60] sm:$0xff] %v1009_v12  ;;  %v1015_v14 = vadd.f32 %v334_v13, %v28_v10  ;;  %452 = vmax.xlane.f32.xlu0 %v1009_v12  ;;  %436 = vmax.xlane.f32.xlu2 %v995_v4 }
  0xcc   :  { %417 = vst [vmem:[%s1206_s5 + $0x28] sm:$0xff] %v1015_v14  ;;  %v256_v15 = vpop.f32.mrf.mxu2 }
  0xcd   :  { %v353_v17 = vpop.f32.mrf.mxu3 }
  0xce   :  { %v354_v18 = vadd.f32 %v353_v17, %v256_v15  ;;  %v239_v19 = vpop.f32.mrf.mxu0 }
  0xcf   :  { %v336_v21 = vpop.f32.mrf.mxu1 }
  0xd0   :  { %v1029_v22 = vadd.f32 %v354_v18, %v36_v16  ;;  %v337_v23 = vadd.f32 %v336_v21, %v239_v19 }
  0xd2   :  { %425 = vst [vmem:[%s1206_s5 + $0x68] sm:$0xff] %v1029_v22  ;;  %v1035_v24 = vadd.f32 %v337_v23, %v29_v20  ;;  %438 = vmax.xlane.f32.xlu2 %v1015_v14 }
  0xd4   :  { %418 = vst [vmem:[%s1206_s5 + $0x30] sm:$0xff] %v1035_v24  ;;  %440 = vmax.xlane.f32.xlu0 %v1035_v24  ;;  %v259_v25 = vpop.f32.mrf.mxu2 }
  0xd5   :  { %v356_v27 = vpop.f32.mrf.mxu3 }
  0xd6   :  { %v357_v29 = vadd.f32 %v356_v27, %v259_v25  ;;  %v241_v30 = vpop.f32.mrf.mxu0 }
  0xd7   :  { %v338_v32 = vpop.f32.mrf.mxu1 }
  0xd8   :  { %v1049_v33 = vadd.f32 %v357_v29, %v37_v26  ;;  %v339_v34 = vadd.f32 %v338_v32, %v241_v30 }
  0xda   :  { %426 = vst [vmem:[%s1206_s5 + $0x70] sm:$0xff] %v1049_v33  ;;  %v1055_v35 = vadd.f32 %v339_v34, %v30_v31  ;;  %456 = vmax.xlane.f32.xlu2 %v1049_v33 }
  0xdc   :  { %419 = vst [vmem:[%s1206_s5 + $0x38] sm:$0xff] %v1055_v35  ;;  %442 = vmax.xlane.f32.xlu1 %v1055_v35  ;;  %v261_v37 = vpop.f32.mrf.mxu2 }
  0xdd   :  { %v358_v40 = vpop.f32.mrf.mxu3 }
  0xde   :  { %v359_v41 = vadd.f32 %v358_v40, %v261_v37 }
  0xe0   :  { %v1066_v42 = vadd.f32 %v359_v41, %v38_v39 }
  0xe2   :  { %427 = vst [vmem:[%s1206_s5 + $0x78] sm:$0xff] %v1066_v42  ;;  %458 = vmax.xlane.f32.xlu0 %v1066_v42 }
  0xe4   :  { %454 = vmax.xlane.f32.xlu1 %v1029_v22 }
 0x117   :  { %v429_v43 = vpop.xlane.xlu0 %428 }
 0x118   :  { %v1075_v44 = vsub.f32 %v917_v28, %v429_v43 }
 0x11a   :  { %v476_v45 = vmul.f32 1.442695, %v1075_v44 }
 0x11c   :  { %748 = vpow2.f32 %v476_v45 }
 0x11d   :  { %v445_v47 = vpop.xlane.xlu2 %444 }
 0x11e   :  { %v1079_v49 = vsub.f32 %v930_v36, %v445_v47 }
 0x11f   :  { %v431_v50 = vpop.xlane.xlu0 %430 }
 0x120   :  { %v492_v51 = vmul.f32 1.442695, %v1079_v49  ;;  %v1083_v52 = vsub.f32 %v936_v38, %v431_v50 }
 0x122   :  { %v749_v53 = vpop.eup %748  ;;  %750 = vpow2.f32 %v492_v51  ;;  %v478_v54 = vmul.f32 1.442695, %v1083_v52 }
 0x123   :  { %508 = vadd.xlane.f32.xlu1 %v749_v53 }
 0x124   :  { %752 = vpow2.f32 %v478_v54 }
 0x127   :  { %v447_v28 = vpop.xlane.xlu0 %446  ;;  %v433_v55 = vpop.xlane.xlu1 %432 }
 0x128   :  { %v751_v57 = vpop.eup %750  ;;  %v1087_v59 = vsub.f32 %v950_v46, %v447_v28  ;;  %v1090_v36 = vsub.f32 %v956_v48, %v433_v55 }
 0x129   :  { %524 = vadd.xlane.f32.xlu0 %v751_v57 }
 0x12a   :  { %v753_v60 = vpop.eup %752  ;;  %v494_v38 = vmul.f32 1.442695, %v1087_v59  ;;  %v480_v61 = vmul.f32 1.442695, %v1090_v36 }
 0x12b   :  { %510 = vadd.xlane.f32.xlu2 %v753_v60 }
 0x12c   :  { %754 = vpow2.f32 %v494_v38 }
 0x12d   :  { %756 = vpow2.f32 %v480_v61 }
 0x12f   :  { %v449_v62 = vpop.xlane.xlu1 %448 }
 0x130   :  { %v1095_v63 = vsub.f32 %v970_v56, %v449_v62 }
 0x132   :  { %v755_v0 = vpop.eup %754  ;;  %v496_v46 = vmul.f32 1.442695, %v1095_v63 }
 0x133   :  { %v757_v1 = vpop.eup %756  ;;  %526 = vadd.xlane.f32.xlu1 %v755_v0 }
 0x134   :  { %758 = vpow2.f32 %v496_v46  ;;  %512 = vadd.xlane.f32.xlu0 %v757_v1 }
 0x135   :  { %v451_v48 = vpop.xlane.xlu2 %450 }
 0x136   :  { %v1099_v3 = vsub.f32 %v989_v2, %v451_v48 }
 0x137   :  { %v435_v5 = vpop.xlane.xlu1 %434 }
 0x138   :  { %v498_v6 = vmul.f32 1.442695, %v1099_v3  ;;  %v1103_v7 = vsub.f32 %v976_v58, %v435_v5 }
 0x13a   :  { %v759_v8 = vpop.eup %758  ;;  %760 = vpow2.f32 %v498_v6  ;;  %v482_v56 = vmul.f32 1.442695, %v1103_v7 }
 0x13b   :  { %528 = vadd.xlane.f32.xlu2 %v759_v8 }
 0x13c   :  { %762 = vpow2.f32 %v482_v56 }
 0x13d   :  { %v453_v9 = vpop.xlane.xlu0 %452  ;;  %v437_v10 = vpop.xlane.xlu2 %436 }
 0x13e   :  { %v1107_v11 = vsub.f32 %v1009_v12, %v453_v9  ;;  %v1110_v2 = vsub.f32 %v995_v4, %v437_v10 }
 0x140   :  { %v761_v13 = vpop.eup %760  ;;  %v500_v15 = vmul.f32 1.442695, %v1107_v11  ;;  %v484_v58 = vmul.f32 1.442695, %v1110_v2 }
 0x141   :  { %530 = vadd.xlane.f32.xlu0 %v761_v13 }
 0x142   :  { %v763_v16 = vpop.eup %762  ;;  %764 = vpow2.f32 %v484_v58 }
 0x143   :  { %514 = vadd.xlane.f32.xlu1 %v763_v16  ;;  %766 = vpow2.f32 %v500_v15 }
 0x145   :  { %v439_v17 = vpop.xlane.xlu2 %438 }
 0x146   :  { %v1115_v18 = vsub.f32 %v1015_v14, %v439_v17 }
 0x147   :  { %v441_v19 = vpop.xlane.xlu0 %440 }
 0x148   :  { %v486_v12 = vmul.f32 1.442695, %v1115_v18  ;;  %v1119_v4 = vsub.f32 %v1035_v24, %v441_v19  ;;  %v765_v20 = vpop.eup %764 }
 0x149   :  { %v767_v21 = vpop.eup %766  ;;  %516 = vadd.xlane.f32.xlu2 %v765_v20 }
 0x14a   :  { %768 = vpow2.f32 %v486_v12  ;;  %v488_v23 = vmul.f32 1.442695, %v1119_v4 }
 0x14b   :  { %532 = vadd.xlane.f32.xlu1 %v767_v21 }
 0x14c   :  { %770 = vpow2.f32 %v488_v23 }
 0x14d   :  { %v457_v25 = vpop.xlane.xlu2 %456 }
 0x14e   :  { %v1123_v26 = vsub.f32 %v1049_v33, %v457_v25 }
 0x14f   :  { %v443_v14 = vpop.xlane.xlu1 %442 }
 0x150   :  { %v769_v27 = vpop.eup %768  ;;  %v504_v29 = vmul.f32 1.442695, %v1123_v26  ;;  %v1127_v30 = vsub.f32 %v1055_v35, %v443_v14 }
 0x151   :  { %518 = vadd.xlane.f32.xlu0 %v769_v27 }
 0x152   :  { %v771_v24 = vpop.eup %770  ;;  %772 = vpow2.f32 %v504_v29  ;;  %v490_v31 = vmul.f32 1.442695, %v1127_v30 }
 0x153   :  { %520 = vadd.xlane.f32.xlu1 %v771_v24 }
 0x154   :  { %774 = vpow2.f32 %v490_v31 }
 0x155   :  { %v459_v32 = vpop.xlane.xlu0 %458 }
 0x156   :  { %v1131_v34 = vsub.f32 %v1066_v42, %v459_v32 }
 0x157   :  { %v455_v33 = vpop.xlane.xlu1 %454 }
 0x158   :  { %v773_v37 = vpop.eup %772  ;;  %v506_v39 = vmul.f32 1.442695, %v1131_v34  ;;  %v1135_v40 = vsub.f32 %v1029_v22, %v455_v33 }
 0x159   :  { %536 = vadd.xlane.f32.xlu0 %v773_v37 }
 0x15a   :  { %v775_v35 = vpop.eup %774  ;;  %776 = vpow2.f32 %v506_v39  ;;  %v502_v41 = vmul.f32 1.442695, %v1135_v40 }
 0x15b   :  { %522 = vadd.xlane.f32.xlu2 %v775_v35 }
 0x15c   :  { %778 = vpow2.f32 %v502_v41 }
 0x160   :  { %v777_v43 = vpop.eup %776 }
 0x161   :  { %538 = vadd.xlane.f32.xlu1 %v777_v43 }
 0x162   :  { %v779_v45 = vpop.eup %778 }
 0x163   :  { %534 = vadd.xlane.f32.xlu2 %v779_v45 }
 0x196   :  { %v509_v42 = vpop.xlane.xlu1 %508 }
 0x197   :  { %780 = vlog2.f32 %v509_v42 }
 0x19c   :  { %v525_v47 = vpop.xlane.xlu0 %524 }
 0x19d   :  { %v781_v50 = vpop.eup %780  ;;  %782 = vlog2.f32 %v525_v47 }
 0x19e   :  { %v541_v51 = vmul.f32 0.6931472, %v781_v50  ;;  %v511_v53 = vpop.xlane.xlu2 %510 }
 0x19f   :  { %784 = vlog2.f32 %v511_v53 }
 0x1a0   :  { %v572_v22 = vsub.f32 %v1075_v44, %v541_v51 }
 0x1a2   :  { %588 = vst [vmem:[%s1207_s4] sm:$0xff] %v572_v22 }
 0x1a3   :  { %v783_v54 = vpop.eup %782 }
 0x1a4   :  { %v557_v28 = vmul.f32 0.6931472, %v783_v54 }
 0x1a5   :  { %v785_v55 = vpop.eup %784 }
 0x1a6   :  { %v580_v57 = vsub.f32 %v1079_v49, %v557_v28  ;;  %v543_v60 = vmul.f32 0.6931472, %v785_v55  ;;  %v527_v38 = vpop.xlane.xlu1 %526 }
 0x1a7   :  { %v513_v61 = vpop.xlane.xlu0 %512  ;;  %786 = vlog2.f32 %v527_v38 }
 0x1a8   :  { %596 = vst [vmem:[%s1207_s4 + $0x40] sm:$0xff] %v580_v57  ;;  %v573_v62 = vsub.f32 %v1083_v52, %v543_v60  ;;  %788 = vlog2.f32 %v513_v61 }
 0x1aa   :  { %589 = vst [vmem:[%s1207_s4 + $0x8] sm:$0xff] %v573_v62 }
 0x1ad   :  { %v787_v44 = vpop.eup %786 }
 0x1ae   :  { %v789_v0 = vpop.eup %788  ;;  %v559_v46 = vmul.f32 0.6931472, %v787_v44  ;;  %v529_v1 = vpop.xlane.xlu2 %528 }
 0x1af   :  { %v545_v49 = vmul.f32 0.6931472, %v789_v0  ;;  %790 = vlog2.f32 %v529_v1 }
 0x1b0   :  { %v581_v48 = vsub.f32 %v1087_v59, %v559_v46 }
 0x1b1   :  { %v574_v5 = vsub.f32 %v1090_v36, %v545_v49 }
 0x1b2   :  { %597 = vst [vmem:[%s1207_s4 + $0x48] sm:$0xff] %v581_v48 }
 0x1b3   :  { %590 = vst [vmem:[%s1207_s4 + $0x10] sm:$0xff] %v574_v5 }
 0x1b4   :  { %v531_v52 = vpop.xlane.xlu0 %530 }
 0x1b5   :  { %v791_v6 = vpop.eup %790  ;;  %792 = vlog2.f32 %v531_v52 }
 0x1b6   :  { %v561_v8 = vmul.f32 0.6931472, %v791_v6  ;;  %v515_v56 = vpop.xlane.xlu1 %514 }
 0x1b7   :  { %794 = vlog2.f32 %v515_v56 }
 0x1b8   :  { %v582_v9 = vsub.f32 %v1095_v63, %v561_v8 }
 0x1ba   :  { %598 = vst [vmem:[%s1207_s4 + $0x50] sm:$0xff] %v582_v9 }
 0x1bb   :  { %v793_v59 = vpop.eup %792 }
 0x1bc   :  { %v563_v36 = vmul.f32 0.6931472, %v793_v59  ;;  %v517_v13 = vpop.xlane.xlu2 %516 }
 0x1bd   :  { %v795_v10 = vpop.eup %794  ;;  %796 = vlog2.f32 %v517_v13 }
 0x1be   :  { %v583_v15 = vsub.f32 %v1099_v3, %v563_v36  ;;  %v547_v58 = vmul.f32 0.6931472, %v795_v10  ;;  %v533_v16 = vpop.xlane.xlu1 %532 }
 0x1bf   :  { %798 = vlog2.f32 %v533_v16 }
 0x1c0   :  { %599 = vst [vmem:[%s1207_s4 + $0x58] sm:$0xff] %v583_v15  ;;  %v575_v63 = vsub.f32 %v1103_v7, %v547_v58 }
 0x1c2   :  { %591 = vst [vmem:[%s1207_s4 + $0x18] sm:$0xff] %v575_v63 }
 0x1c3   :  { %v797_v17 = vpop.eup %796 }
 0x1c4   :  { %v519_v19 = vpop.xlane.xlu0 %518  ;;  %v549_v20 = vmul.f32 0.6931472, %v797_v17 }
 0x1c5   :  { %v799_v12 = vpop.eup %798  ;;  %800 = vlog2.f32 %v519_v19 }
 0x1c6   :  { %v565_v3 = vmul.f32 0.6931472, %v799_v12  ;;  %v521_v21 = vpop.xlane.xlu1 %520  ;;  %v576_v23 = vsub.f32 %v1110_v2, %v549_v20 }
 0x1c7   :  { %802 = vlog2.f32 %v521_v21 }
 0x1c8   :  { %v584_v25 = vsub.f32 %v1107_v11, %v565_v3  ;;  %592 = vst [vmem:[%s1207_s4 + $0x20] sm:$0xff] %v576_v23 }
 0x1ca   :  { %600 = vst [vmem:[%s1207_s4 + $0x60] sm:$0xff] %v584_v25 }
 0x1cb   :  { %v801_v7 = vpop.eup %800 }
 0x1cc   :  { %v551_v14 = vmul.f32 0.6931472, %v801_v7  ;;  %v537_v27 = vpop.xlane.xlu0 %536 }
 0x1cd   :  { %v803_v29 = vpop.eup %802  ;;  %804 = vlog2.f32 %v537_v27 }
 0x1ce   :  { %v577_v24 = vsub.f32 %v1115_v18, %v551_v14  ;;  %v553_v31 = vmul.f32 0.6931472, %v803_v29  ;;  %v523_v2 = vpop.xlane.xlu2 %522 }
 0x1cf   :  { %806 = vlog2.f32 %v523_v2 }
 0x1d0   :  { %593 = vst [vmem:[%s1207_s4 + $0x28] sm:$0xff] %v577_v24  ;;  %v578_v11 = vsub.f32 %v1119_v4, %v553_v31 }
 0x1d2   :  { %594 = vst [vmem:[%s1207_s4 + $0x30] sm:$0xff] %v578_v11 }
 0x1d3   :  { %v805_v32 = vpop.eup %804 }
 0x1d4   :  { %v569_v33 = vmul.f32 0.6931472, %v805_v32  ;;  %v539_v37 = vpop.xlane.xlu1 %538 }
 0x1d5   :  { %v807_v39 = vpop.eup %806  ;;  %808 = vlog2.f32 %v539_v37 }
 0x1d6   :  { %v586_v18 = vsub.f32 %v1123_v26, %v569_v33  ;;  %v555_v35 = vmul.f32 0.6931472, %v807_v39  ;;  %v535_v41 = vpop.xlane.xlu2 %534 }
 0x1d7   :  { %810 = vlog2.f32 %v535_v41 }
 0x1d8   :  { %602 = vst [vmem:[%s1207_s4 + $0x70] sm:$0xff] %v586_v18  ;;  %v579_v4 = vsub.f32 %v1127_v30, %v555_v35 }
 0x1da   :  { %595 = vst [vmem:[%s1207_s4 + $0x38] sm:$0xff] %v579_v4 }
 0x1db   :  { %v809_v43 = vpop.eup %808 }
 0x1dc   :  { %v571_v45 = vmul.f32 0.6931472, %v809_v43 }
 0x1dd   :  { %v811_v42 = vpop.eup %810 }
 0x1de   :  { %v587_v47 = vsub.f32 %v1131_v34, %v571_v45  ;;  %v567_v50 = vmul.f32 0.6931472, %v811_v42 }
 0x1e0   :  { %603 = vst [vmem:[%s1207_s4 + $0x78] sm:$0xff] %v587_v47  ;;  %v585_v26 = vsub.f32 %v1135_v40, %v567_v50 }
 0x1e2   :  { %601 = vst [vmem:[%s1207_s4 + $0x68] sm:$0xff] %v585_v26 }

</bundles_post_ra>
